<compile_context>
chip_gen: v5e
topology: v5e:2x2
jax: 0.10.0
libtpu: 0.0.40
codegen_flags: <defaults>
</compile_context>

<pallas_src>
import math
import jax
import jax.numpy as jnp
from jax.experimental import pallas as pl
from jax.experimental.pallas import tpu as pltpu


def intermediate_kernel(x_ref, w_ref, b_ref, o_ref):
    # x_ref: (1, S, H)   w_ref: (H, I)   b_ref: (1, I)   o_ref: (1, S, I)
    x = x_ref[0]                                              # (S, H)
    y = jnp.dot(x, w_ref[...], preferred_element_type=jnp.float32)
    y = y + b_ref[...]                                        # (1, I) broadcasts over rows
    o_ref[0] = jnp.maximum(y, 0.0).astype(o_ref.dtype)        # ReLU


def intermediate_forward(x, w, b):
    """y = relu(x @ w + b), x: (B, S, H), w: (H, I), b: (1, I)."""
    B, S, H = x.shape
    I = w.shape[1]

    return pl.pallas_call(
        intermediate_kernel,
        out_shape=jax.ShapeDtypeStruct((B, S, I), x.dtype),
        grid_spec=pltpu.PrefetchScalarGridSpec(
            num_scalar_prefetch=0,
            grid=(B,),
            in_specs=[
                pl.BlockSpec((1, S, H), lambda b_: (b_, 0, 0)),   # x
                pl.BlockSpec((H, I), lambda b_: (0, 0)),          # W (resident)
                pl.BlockSpec((1, I), lambda b_: (0, 0)),          # bias (resident)
            ],
            out_specs=pl.BlockSpec((1, S, I), lambda b_: (b_, 0, 0)),
        ),
        compiler_params=pltpu.CompilerParams(
            dimension_semantics=("parallel",),
        ),
    )(x, w, b)


def reference_forward(x, w, b):
    """Pure-JAX reference mirroring the PyTorch module (eval mode)."""
    return jax.nn.relu(x @ w + b[0])


if __name__ == "__main__":
    B, S, H = 2, 8, 32          # batch, sequence, hidden_size
    I = 64                      # intermediate_size

    key = jax.random.PRNGKey(0)
    kx, kw, kb = jax.random.split(key, 3)

    x = jax.random.normal(kx, (B, S, H), jnp.float32)

    # torch nn.Linear init: U(-1/sqrt(H), 1/sqrt(H)); stored transposed as (H, I)
    scale = 1.0 / math.sqrt(H)
    w = jax.random.uniform(kw, (H, I), jnp.float32, -scale, scale)
    b = jax.random.uniform(kb, (1, I), jnp.float32, -scale, scale)

    out = intermediate_forward(x, w, b)
    out = jax.block_until_ready(out)

    ref = reference_forward(x, w, b)
    assert out.shape == (B, S, I)
    assert jnp.allclose(out, ref, atol=1e-5, rtol=1e-5), "mismatch vs reference"

    print("KERNEL_OK")
</pallas_src>

<mosaic_0001>
module attributes {stable_mosaic.version = 11 : i64} {
  func.func @intermediate_kernel(%arg0: i32, %arg1: memref<1x8x32xf32, #tpu.memory_space<vmem>>, %arg2: memref<32x64xf32, #tpu.memory_space<vmem>>, %arg3: memref<1x64xf32, #tpu.memory_space<vmem>>, %arg4: memref<1x8x64xf32, #tpu.memory_space<vmem>>) attributes {dimension_semantics = [#tpu.dimension_semantics<parallel>], iteration_bounds = array<i64: 2>, scalar_prefetch = 0 : i64, scratch_operands = 0 : i64, tpu.core_type = #tpu.core_type<tc>, window_params = [{transform_indices = @transform_0, window_bounds = array<i64: 1, 8, 32>}, {pipeline_mode = #tpu.pipeline_mode<synchronous>, transform_indices = @transform_1, window_bounds = array<i64: 32, 64>}, {pipeline_mode = #tpu.pipeline_mode<synchronous>, transform_indices = @transform_2, window_bounds = array<i64: 1, 64>}, {transform_indices = @transform_3, window_bounds = array<i64: 1, 8, 64>}]} {
    %c0 = arith.constant 0 : index
    %c0_0 = arith.constant 0 : index
    %c0_1 = arith.constant 0 : index
    %0 = vector.load %arg1[%c0, %c0_0, %c0_1] : memref<1x8x32xf32, #tpu.memory_space<vmem>>, vector<1x8x32xf32>
    %1 = vector.shape_cast %0 : vector<1x8x32xf32> to vector<8x32xf32>
    %c0_2 = arith.constant 0 : index
    %c0_3 = arith.constant 0 : index
    %2 = vector.load %arg2[%c0_2, %c0_3] : memref<32x64xf32, #tpu.memory_space<vmem>>, vector<32x64xf32>
    %cst = arith.constant dense<0.000000e+00> : vector<8x64xf32>
    %3 = tpu.matmul %1, %2, %cst {dimension_numbers = #tpu.dot_dimension_numbers<[1], [0], [0], [1], [0, 0, 1, 1], [], []>} : vector<8x32xf32>, vector<32x64xf32>, vector<8x64xf32> -> vector<8x64xf32>
    %c0_4 = arith.constant 0 : index
    %c0_5 = arith.constant 0 : index
    %4 = vector.load %arg3[%c0_4, %c0_5] : memref<1x64xf32, #tpu.memory_space<vmem>>, vector<1x64xf32>
    %5 = vector.broadcast %4 : vector<1x64xf32> to vector<8x64xf32>
    %6 = arith.addf %3, %5 : vector<8x64xf32>
    %cst_6 = arith.constant 0.000000e+00 : f32
    %7 = vector.broadcast %cst_6 : f32 to vector<8x64xf32>
    %8 = arith.maximumf %6, %7 : vector<8x64xf32>
    %c0_7 = arith.constant 0 : index
    %c0_8 = arith.constant 0 : index
    %c0_9 = arith.constant 0 : index
    %9 = vector.load %arg4[%c0_7, %c0_8, %c0_9] : memref<1x8x64xf32, #tpu.memory_space<vmem>>, vector<1x8x64xf32>
    %10 = vector.shape_cast %9 : vector<1x8x64xf32> to vector<8x64xf32>
    %11 = vector.shape_cast %8 : vector<8x64xf32> to vector<1x8x64xf32>
    tpu.vector_store %arg4[%c0_7, %c0_8, %c0_9], %11 {strides = array<i32>} : memref<1x8x64xf32, #tpu.memory_space<vmem>>, vector<1x8x64xf32>,
    return
  }
  func.func @transform_0(%arg0: i32) -> (i32, i32, i32) {
    %c0_i32 = arith.constant 0 : i32
    %c0_i32_0 = arith.constant 0 : i32
    %c0_i32_1 = arith.constant 0 : i32
    return %arg0, %c0_i32, %c0_i32_0 : i32, i32, i32
  }
  func.func @transform_1(%arg0: i32) -> (i32, i32) {
    %c0_i32 = arith.constant 0 : i32
    %c0_i32_0 = arith.constant 0 : i32
    %c0_i32_1 = arith.constant 0 : i32
    return %c0_i32, %c0_i32_0 : i32, i32
  }
  func.func @transform_2(%arg0: i32) -> (i32, i32) {
    %c0_i32 = arith.constant 0 : i32
    %c0_i32_0 = arith.constant 0 : i32
    %c0_i32_1 = arith.constant 0 : i32
    return %c0_i32, %c0_i32_0 : i32, i32
  }
  func.func @transform_3(%arg0: i32) -> (i32, i32, i32) {
    %c0_i32 = arith.constant 0 : i32
    %c0_i32_0 = arith.constant 0 : i32
    %c0_i32_1 = arith.constant 0 : i32
    return %arg0, %c0_i32, %c0_i32_0 : i32, i32, i32
  }
}

</mosaic_0001>

<bundles_post_ra>
// kernel: tpu_custom_call.1
= control target key start
LH: loop header
LB: loop body
LE: loop exit
PB: predicated region body
PF: predicated region fallthrough
CT: control target
= control target key end

     0   :  { %8 = vsyncpa [#allocation3], 0  ;;  %s706_s0 = inlined_call_operand.hbm [shape: f32[2,8,32], index: 0, kind: input, shape index: {}]   ;;  %s707_s1 = inlined_call_operand.hbm [shape: f32[32,64], index: 1, kind: input, shape index: {}]   ;;  %s708_s2 = inlined_call_operand.vmem [shape: f32[1,64], index: 2, kind: input, shape index: {}]   ;;  %s709_s3 = inlined_call_operand.hbm [shape: f32[2,8,64], index: 3, kind: output, shape index: {}]  }
   0x1   :  { %10 = vsyncpa [#allocation3 + $0x1], 0 }
   0x2   :  { %11 = vsyncpa [#allocation6], 0 }
   0x3   :  { %12 = vsyncpa [#allocation4], 0 }
   0x4   :  { %14 = vsyncpa [#allocation4 + $0x1], 0  ;;  %s567_s12 = smov 0   ;;  %s569_s13 = smov 0  }
   0x5   :  { %s571_s14 = smov 0   ;;  %s573_s15 = smov 0  }
   0x6 LB: > { %s130_s18 = sshll.u32 %s707_s1, 4  ;;  %s591_s19 = sadd.s32 4294967295, %s542_s15   ;;  %s542_s15 = sphi %s573_s15, %s719_s15   ;;  %s538_s14 = sphi %s571_s14, %s718_s14   ;;  %s534_s13 = sphi %s569_s13, %s717_s13   ;;  %s530_s12 = sphi %s567_s12, %s716_s12   ;;  %s131_s18 = int_to_ptr.hbm [resolvable:$true] %s130_s18 }
   0x7   : > { %p338_p0 = scmp.ge.s32.totalorder %s542_s15, 1  ;;  %p41_p1 = scmp.eq.s32.totalorder %s591_s19, 0 }
   0x8   : > { %p119_p2 = scmp.lt.s32.totalorder %s542_s15, 3  ;;  %s544_s21 = smov [#allocation5]  }
   0x9   : > { %s132_s22 = sshll.u32 %s544_s21, 4  ;;  %s545_s23 = smov 128   ;;  %s133_s22 = int_to_ptr.vmem [resolvable:$true] %s132_s22 }
   0xa   : > { %p596_p3 = pnand %p338_p0, %p119_p2  ;;  %s546_s24 = smov 8  }
   0xb   : > { %s337_s25 = sadd.s32 4294967294, %s542_s15   ;;  %s607_s26 = sadd.s32 1, %s542_s15  }
   0xc   : > { %p360_p4 = pneg %p596_p3  ;;  %s27_s27 = sadd.s32 1, %s538_s14 }
   0xd   : > { %s24_s28 = ssub.s32 %s542_s15, %s607_s26  ;;  %p34_p7 = scmp.ne.s32.totalorder %s538_s14, %s534_s13 }
   0xe   : > { %p361_p6 = pnand %p360_p4, %p41_p1  ;;  %p25_p8 = scmp.eq.s32.totalorder %s24_s28, 0 }
   0xf   : > { %p35_p9 = scmp.eq.s32.totalorder %s542_s15, 0  ;;  %p40_p10 = scmp.ne.s32.totalorder %s534_s13, %s530_s12 }
  0x10   : > { %363 = dma.hbm_to_vmem [thread:$0]  (!%p361_p6), %s131_s18, 512, %s133_s22, [#allocation6], %s545_s23, %s545_s23, %s546_s24  }
  0x11   : > { %p106_p11 = scmp.eq.s32.totalorder %s591_s19, 1  ;;  %p623_p12 = por %p41_p1, %p40_p10 }
  0x12   : > { %s619_s29 = scalar_select %p25_p8, %s538_s14, %s27_s27  }
  0x13   : > { %p627_p13 = por %p106_p11, %p34_p7  ;;  %p112_p0 = scmp.eq.s32.totalorder %s337_s25, 1 }
  0x14   : > { %p36_p2 = por %p35_p9, %p34_p7  ;;  %s149_s5 = sand.u32 1, %s538_s14  }
  0x15   : > { %p632_p4 = por %p112_p0, %p40_p10  ;;  %p373_p6 = scmp.lt.s32.totalorder %s542_s15, 2 }
  0x16   : > { %s341_s7 = sshll.u32 %s149_s5, 3  ;;  %s342_s8 = sshll.u32 %s542_s15, 3 }
  0x17   : > { %s157_s11 = scalar_lea.hbm %s706_s0, %s342_s8  ;;  %s153_s17 = scalar_lea.vmem [#allocation2], %s341_s7 }
  0x18   : > { %s159_s16 = sshll.u32 %s157_s11, 4  ;;  %s161_s18 = sshll.u32 %s153_s17, 4  ;;  %s160_s16 = int_to_ptr.hbm [resolvable:$true] %s159_s16  ;;  %s162_s18 = int_to_ptr.vmem [resolvable:$true] %s161_s18 }
  0x19   : > { %p641_p8 = pnand %p373_p6, %p36_p2  ;;  %s150_s22 = scalar_lea.sflag [#allocation3], %s149_s5 }
  0x1a   : > { %s442_s23 = sshra.s32 %s160_s16, 4  ;;  %s449_s28 = scalar_lea.hbm %s706_s0, 16  ;;  %s443_s23 = int_to_ptr.hbm [resolvable:$true] %s442_s23 }
  0x1b   : > { %s444_s24 = scalar_lea.hbm %s443_s23, 8  ;;  %p446_p9 = pneg %p641_p8 }
  0x1c   : > { %p445_p7 = scmp.ne.s32.totalorder %s443_s23, %s444_s24  ;;  %p450_p0 = scmp.lt.s32.totalorder %s443_s23, %s706_s0 }
  0x1d   : > { %p451_p2 = scmp.lt.s32.totalorder %s449_s28, %s444_s24 }
  0x1e   : > { %p447_p10 = pnand %p446_p9, %p445_p7 }
  0x1f   : > { %p452_p6 = por %p451_p2, %p450_p0 }
  0x20   : > { %p448_p11 = pneg %p447_p10 }
  0x22   : > { %p453_p5 = pnand %p452_p6, %p448_p11 }
  0x24   : > { %456 = shalt.err (!%p453_p5)
}
  0x25   : > { %367 = dma.hbm_to_vmem [thread:$0]  (!%p641_p8), %s160_s16, 128, %s162_s18, %s150_s22  }
  0x26   : > { %170 = sbr.rel (%p596_p3) target bundleno = 187 (0xbb), region = 32  ;;  %s658_s5 = sand.u32 (!%p596_p3), 1, %s534_s13  }
  0x27   : > { %s344_s9 = sshll.u32 (!%p596_p3), %s658_s5, 3  ;;  %s173_s10 = scalar_lea.sflag (!%p596_p3), [#allocation3], %s658_s5 }
  0x28   : > { %s176_s11 = scalar_lea.vmem (!%p596_p3), [#allocation2], %s344_s9 }
  0x2b   : > { %517 = dma.done.wait (%p623_p12), %s173_s10, 128  }
  0x2c   : > { %519 = vsyncadd (%p623_p12), %s173_s10, 4294967168 }
  0x2d   : > { %521 = dma.done.wait (%p41_p1), [#allocation6], 512  }
  0x2e   : > { %523 = vsyncadd (%p41_p1), [#allocation6], 4294966784  ;;  %v209_v0 = vld [vmem:[#allocation5 + $0x18] sm:$0xff]  ;;  %v208_v1 = vld [vmem:[#allocation5 + $0x10] sm:$0xff]  ;;  %vm214_vm0 = vcmask 261120   ;;  %s349_s20 = sshll.u32 %s591_s19, 3 }
  0x2f   : > { %230 = vmatpush.msra.mxu0 %v209_v0  ;;  %v207_v2 = vld [vmem:[#allocation5 + $0x8] sm:$0xff]  ;;  %v206_v3 = vld [vmem:[#allocation5] sm:$0xff]  ;;  %v205_v4 = vld [vmem:[%s176_s11] sm:$0xff]  ;;  %s252_s21 = scalar_lea.hbm %s709_s3, %s349_s20  ;;  %s204_s22 = scalar_lea.vmem [#allocation7], %s344_s9  ;;  %vm239_vm1 = vcmask 523264  }
  0x30   : > { %v411_v5 = vld [vmem:[%s708_s2] ss:$0 sm:$0xff]  ;;  %s254_s23 = sshll.u32 %s204_s22, 4  ;;  %s256_s24 = sshll.u32 %s252_s21, 4  ;;  %s255_s23 = int_to_ptr.vmem [resolvable:$true] %s254_s23  ;;  %s257_s24 = int_to_ptr.hbm [resolvable:$true] %s256_s24 }
  0x31   : > { %231 = vmatpush.msra.mxu0 %v208_v1  ;;  %s242_s19 = scalar_lea.sflag [#allocation4], %s658_s5  ;;  %s486_s25 = sshra.s32 %s257_s24, 4  ;;  %s487_s25 = int_to_ptr.hbm [resolvable:$true] %s486_s25 }
  0x32   : > { %s488_s27 = scalar_lea.hbm %s487_s25, 8  ;;  %s492_s8 = scalar_lea.hbm %s709_s3, 16 }
  0x33   : > { %232 = vmatpush.msra.mxu0 %v207_v2  ;;  %p489_p1 = scmp.ne.s32.totalorder %s487_s25, %s488_s27  ;;  %p493_p12 = scmp.lt.s32.totalorder %s487_s25, %s709_s3 }
  0x34   : > { %p494_p8 = scmp.lt.s32.totalorder %s492_s8, %s488_s27 }
  0x35   : > { %233 = vmatpush.msra.mxu0 %v206_v3  ;;  %p490_p3 = pnand %p489_p1, %p627_p13 }
  0x36   : > { %347 = vmatmul.msk.f32.vlgmr.msra.gmra.mxu0 %vm214_vm0, %v205_v4  ;;  %p495_p7 = por %p494_p8, %p493_p12 }
  0x37   : > { %p491_p5 = pneg %p490_p3 }
  0x39   : > { %p496_p9 = pnand %p495_p7, %p491_p5 }
  0xb3   : > { %v235_v6 = vpop.f32.mrf.mxu0 }
  0xb4   : > { %v236_v7 = vadd.f32 %v411_v5, %v235_v6 }
  0xb6   : > { %v238_v8 = vmax.f32 %v236_v7, 0.0 }
  0xb8   : > { %240 = vst.msk [vmem:[%s204_s22] sm:$0xff] %vm239_vm1, %v238_v8 }
  0xb9   : > { %499 = shalt.err (!%p496_p9)
}
  0xba   : > { %358 = dma.vmem_to_hbm [thread:$0]  (%p627_p13), %s255_s23, 128, %s257_s24, %s242_s19  }
  0xbb PF: > { %s268_s5 = sand.u32 1, %s530_s12   ;;  %p715_p10 = scmp.ge.s32.totalorder %s542_s15, 2 }
  0xbc   : > { %s269_s11 = scalar_lea.sflag [#allocation4], %s268_s5 }
  0xbd   : > { %p369_p11 = pnand %p715_p10, %p632_p4 }
  0xbf   : > { %p370_p0 = pneg %p369_p11 }
  0xc1   : > { %525 = dma.done.wait (%p370_p0), %s269_s11, 128  }
  0xc2   : > { %527 = vsyncadd (%p370_p0), %s269_s11, 4294967168  ;;  %p17_p2 = scmp.ge.s32.totalorder %s607_s26, 4   ;;  %s716_s12 = smov %s534_s13 }
  0xc3   : > { %s717_s13 = smov %s538_s14  ;;  %s718_s14 = smov %s619_s29 }
  0xc4   : > { %s719_s15 = smov %s607_s26  ;;  %19 = sbr.rel (!%p17_p2) target bundleno = 6 (0x6), region = 81 }
  0xc9   :  { %275 = vsyncpa [#allocation3], 1 }
  0xca   :  { %277 = vsyncpa [#allocation3 + $0x1], 1 }
  0xcb   :  { %278 = vsyncpa [#allocation6], 1 }
  0xcc   :  { %279 = vsyncpa [#allocation4], 1 }
  0xcd   :  { %281 = vsyncpa [#allocation4 + $0x1], 1 }

</bundles_post_ra>
